<compile_context>
chip_gen: v7x
topology: tpu7x:2x2x1
jax: 0.10.0
libtpu: 0.0.40
codegen_flags: <defaults>
</compile_context>

<pallas_src>
import functools

import jax
import jax.numpy as jnp
from jax import lax
from jax.experimental import pallas as pl
from jax.experimental.pallas import tpu as pltpu


def _layernorm_kernel(x_ref, w_ref, b_ref, o_ref, *, eps: float, d_model: int):
    # x_ref: (row_tile, d_model); w_ref/b_ref: (1, d_model) already f32.
    x = x_ref[...].astype(jnp.float32)
    inv_d = jnp.float32(1.0 / d_model)
    # Two-pass statistics: mean, then centered second moment (unbiased=False).
    mean = jnp.sum(x, axis=-1, keepdims=True) * inv_d
    diff = x - mean
    var = jnp.sum(diff * diff, axis=-1, keepdims=True) * inv_d
    inv_std = lax.rsqrt(var + jnp.float32(eps))
    o_ref[...] = (diff * inv_std * w_ref[...] + b_ref[...]).astype(o_ref.dtype)


def _round_up(x: int, m: int) -> int:
    return ((x + m - 1) // m) * m


def layernorm_pallas(residual: jax.Array, w: jax.Array, b: jax.Array,
                     eps: float = 1e-5, row_tile: int = 1024,
                     vmem_budget_bytes: int = 32 << 20) -> jax.Array:
    """LayerNorm over the last dim of residual [..., d_model]."""
    orig_shape = residual.shape
    d_model = orig_shape[-1]
    rows = 1
    for s in orig_shape[:-1]:
        rows *= s

    in_bytes = jnp.dtype(residual.dtype).itemsize
    # Sublane packing multiple: 8 for 32-bit, 16 for bf16, 32 for int8/fp8.
    sub = max(8, 32 // max(in_bytes, 1))
    # Lane-padded width used only for VMEM accounting (Mosaic pads lanes to 128).
    d_lane = _round_up(d_model, 128)

    # VMEM per tile row: double-buffered input + output blocks plus in-kernel
    # f32 temporaries (x upcast, diff, diff*diff).
    per_row_bytes = d_lane * (2 * in_bytes + 2 * in_bytes + 3 * 4)
    max_rows_by_vmem = max(sub, (vmem_budget_bytes // per_row_bytes) // sub * sub)

    # Keep at least 2 grid steps so dimension_semantics=("parallel",) can shard
    # the grid across v7x's two TensorCores.
    half_rows = _round_up(max(1, -(-rows // 2)), sub)

    row_tile = int(min(row_tile, max_rows_by_vmem, half_rows))
    row_tile = max(sub, (row_tile // sub) * sub)

    grid = pl.cdiv(rows, row_tile)

    # No padding, no trailing slice: reshape of leading dims is layout-free.
    x2d = residual.reshape(rows, d_model)
    w2d = w.astype(jnp.float32).reshape(1, d_model)
    b2d = b.astype(jnp.float32).reshape(1, d_model)

    needed = (2 * row_tile * d_lane * in_bytes      # input double buffer
              + 2 * row_tile * d_lane * in_bytes    # output double buffer
              + 3 * row_tile * d_lane * 4           # f32 temporaries
              + 2 * 2 * d_lane * 4)                 # resident w, b
    vmem_limit = int(min(max(needed + needed // 4, 16 << 20), 40 << 20))

    kernel = functools.partial(_layernorm_kernel, eps=eps, d_model=d_model)

    cost = pl.CostEstimate(
        flops=8 * rows * d_model,
        transcendentals=rows,
        bytes_accessed=2 * rows * d_model * in_bytes + 2 * d_model * 4,
    )

    out2d = pl.pallas_call(
        kernel,
        out_shape=jax.ShapeDtypeStruct((rows, d_model), residual.dtype),
        grid_spec=pltpu.PrefetchScalarGridSpec(
            num_scalar_prefetch=0,
            grid=(grid,),
            in_specs=[
                pl.BlockSpec((row_tile, d_model), lambda i: (i, 0)),
                pl.BlockSpec((1, d_model), lambda i: (0, 0)),
                pl.BlockSpec((1, d_model), lambda i: (0, 0)),
            ],
            out_specs=pl.BlockSpec((row_tile, d_model), lambda i: (i, 0)),
        ),
        compiler_params=pltpu.CompilerParams(
            dimension_semantics=("parallel",),
            vmem_limit_bytes=vmem_limit,
        ),
        cost_estimate=cost,
    )(x2d, w2d, b2d)

    return out2d.reshape(orig_shape)


def layernorm_ref(residual, w, b, eps=1e-5):
    mean = jnp.mean(residual, axis=-1, keepdims=True)
    var = jnp.var(residual, axis=-1, keepdims=True)
    normed = (residual - mean) / jnp.sqrt(var + eps)
    return normed * w + b


if __name__ == "__main__":
    # Small shapes consistent with the module (Config.d_model = 768).
    batch, posn, d_model = 2, 8, 768
    eps = 1e-5

    key = jax.random.PRNGKey(0)
    kx, kw, kb = jax.random.split(key, 3)
    x = jax.random.normal(kx, (batch, posn, d_model), dtype=jnp.float32)
    # Module init is w=ones, b=zeros; perturb deterministically so scale/shift are exercised.
    w = jnp.ones((d_model,), dtype=jnp.float32) + 0.1 * jax.random.normal(kw, (d_model,), dtype=jnp.float32)
    b = 0.01 * jax.random.normal(kb, (d_model,), dtype=jnp.float32)

    out = jax.block_until_ready(layernorm_pallas(x, w, b, eps=eps))
    ref = layernorm_ref(x, w, b, eps=eps)
    assert out.shape == (batch, posn, d_model)
    assert jnp.allclose(out, ref, atol=1e-5, rtol=1e-5), "mismatch vs reference"

    # Partial last row-block (rows=15, tile=8) + d_model not a multiple of 128
    # (full-d_model lane block, no padding anywhere).
    x2 = jax.random.normal(kx, (3, 5, 100), dtype=jnp.float32)
    w2 = jnp.ones((100,), dtype=jnp.float32)
    b2 = jnp.zeros((100,), dtype=jnp.float32)
    out2 = jax.block_until_ready(layernorm_pallas(x2, w2, b2, eps=eps))
    ref2 = layernorm_ref(x2, w2, b2, eps=eps)
    assert jnp.allclose(out2, ref2, atol=1e-5, rtol=1e-5), "mismatch vs reference (partial block, d=100)"

    # rows % row_tile != 0 at a larger tile (rows=1000 -> tile=504, grid=2, partial 2nd block).
    x3 = jax.random.normal(kb, (1, 1000, 768), dtype=jnp.float32)
    out3 = jax.block_until_ready(layernorm_pallas(x3, w, b, eps=eps))
    ref3 = layernorm_ref(x3, w, b, eps=eps)
    assert jnp.allclose(out3, ref3, atol=1e-5, rtol=1e-5), "mismatch vs reference (partial large block)"

    print("KERNEL_OK")
</pallas_src>

<mosaic_0001>
module attributes {stable_mosaic.version = 11 : i64} {
  func.func @_layernorm_kernel(%arg0: i32, %arg1: memref<8x768xf32, #tpu.memory_space<vmem>>, %arg2: memref<1x768xf32, #tpu.memory_space<vmem>>, %arg3: memref<1x768xf32, #tpu.memory_space<vmem>>, %arg4: memref<8x768xf32, #tpu.memory_space<vmem>>) attributes {dimension_semantics = [#tpu.dimension_semantics<parallel>], iteration_bounds = array<i64: 2>, scalar_prefetch = 0 : i64, scratch_operands = 0 : i64, tpu.core_type = #tpu.core_type<tc>, window_params = [{transform_indices = @transform_0, window_bounds = array<i64: 8, 768>}, {pipeline_mode = #tpu.pipeline_mode<synchronous>, transform_indices = @transform_1, window_bounds = array<i64: 1, 768>}, {pipeline_mode = #tpu.pipeline_mode<synchronous>, transform_indices = @transform_2, window_bounds = array<i64: 1, 768>}, {transform_indices = @transform_3, window_bounds = array<i64: 8, 768>}]} {
    %c0 = arith.constant 0 : index
    %c0_0 = arith.constant 0 : index
    %0 = vector.load %arg1[%c0, %c0_0] : memref<8x768xf32, #tpu.memory_space<vmem>>, vector<8x768xf32>
    %cst = arith.constant dense<0.000000e+00> : vector<8xf32>
    %1 = vector.multi_reduction <add>, %0, %cst [1] : vector<8x768xf32> to vector<8xf32>
    %2 = vector.shape_cast %1 : vector<8xf32> to vector<8x1xf32>
    %cst_1 = arith.constant 0.00130208337 : f32
    %3 = vector.broadcast %cst_1 : f32 to vector<8x1xf32>
    %4 = arith.mulf %2, %3 : vector<8x1xf32>
    %5 = vector.broadcast %4 : vector<8x1xf32> to vector<8x768xf32>
    %6 = arith.subf %0, %5 : vector<8x768xf32>
    %7 = arith.mulf %6, %6 : vector<8x768xf32>
    %cst_2 = arith.constant dense<0.000000e+00> : vector<8xf32>
    %8 = vector.multi_reduction <add>, %7, %cst_2 [1] : vector<8x768xf32> to vector<8xf32>
    %9 = vector.shape_cast %8 : vector<8xf32> to vector<8x1xf32>
    %cst_3 = arith.constant 0.00130208337 : f32
    %10 = vector.broadcast %cst_3 : f32 to vector<8x1xf32>
    %11 = arith.mulf %9, %10 : vector<8x1xf32>
    %cst_4 = arith.constant 9.99999974E-6 : f32
    %12 = vector.broadcast %cst_4 : f32 to vector<8x1xf32>
    %13 = arith.addf %11, %12 : vector<8x1xf32>
    %14 = math.rsqrt %13 : vector<8x1xf32>
    %15 = vector.broadcast %14 : vector<8x1xf32> to vector<8x768xf32>
    %16 = arith.mulf %6, %15 : vector<8x768xf32>
    %c0_5 = arith.constant 0 : index
    %c0_6 = arith.constant 0 : index
    %17 = vector.load %arg2[%c0_5, %c0_6] : memref<1x768xf32, #tpu.memory_space<vmem>>, vector<1x768xf32>
    %18 = vector.broadcast %17 : vector<1x768xf32> to vector<8x768xf32>
    %19 = arith.mulf %16, %18 : vector<8x768xf32>
    %c0_7 = arith.constant 0 : index
    %c0_8 = arith.constant 0 : index
    %20 = vector.load %arg3[%c0_7, %c0_8] : memref<1x768xf32, #tpu.memory_space<vmem>>, vector<1x768xf32>
    %21 = vector.broadcast %20 : vector<1x768xf32> to vector<8x768xf32>
    %22 = arith.addf %19, %21 : vector<8x768xf32>
    %c0_9 = arith.constant 0 : index
    %c0_10 = arith.constant 0 : index
    %23 = vector.load %arg4[%c0_9, %c0_10] : memref<8x768xf32, #tpu.memory_space<vmem>>, vector<8x768xf32>
    tpu.vector_store %arg4[%c0_9, %c0_10], %22 {strides = array<i32>} : memref<8x768xf32, #tpu.memory_space<vmem>>, vector<8x768xf32>,
    return
  }
  func.func @transform_0(%arg0: i32) -> (i32, i32) {
    %c0_i32 = arith.constant 0 : i32
    %c0_i32_0 = arith.constant 0 : i32
    return %arg0, %c0_i32 : i32, i32
  }
  func.func @transform_1(%arg0: i32) -> (i32, i32) {
    %c0_i32 = arith.constant 0 : i32
    %c0_i32_0 = arith.constant 0 : i32
    %c0_i32_1 = arith.constant 0 : i32
    return %c0_i32, %c0_i32_0 : i32, i32
  }
  func.func @transform_2(%arg0: i32) -> (i32, i32) {
    %c0_i32 = arith.constant 0 : i32
    %c0_i32_0 = arith.constant 0 : i32
    %c0_i32_1 = arith.constant 0 : i32
    return %c0_i32, %c0_i32_0 : i32, i32
  }
  func.func @transform_3(%arg0: i32) -> (i32, i32) {
    %c0_i32 = arith.constant 0 : i32
    %c0_i32_0 = arith.constant 0 : i32
    return %arg0, %c0_i32 : i32, i32
  }
}

</mosaic_0001>

<bundles_post_ra>
// kernel: tpu_custom_call.1
= control target key start
LH: loop header
LB: loop body
LE: loop exit
PB: predicated region body
PF: predicated region fallthrough
CT: control target
= control target key end

     0   :  { %8 = vsyncpa [#allocation3], 0  ;;  %s853_s0 = inlined_call_operand.hbm [shape: f32[16,768], index: 0, kind: input, shape index: {}]   ;;  %s854_s1 = inlined_call_operand.hbm [shape: f32[1,768], index: 1, kind: input, shape index: {}]   ;;  %s855_s2 = inlined_call_operand.vmem [shape: f32[1,768], index: 2, kind: input, shape index: {}]   ;;  %s856_s3 = inlined_call_operand.hbm [shape: f32[16,768], index: 3, kind: output, shape index: {}]  }
   0x1   :  { %10 = vsyncpa [#allocation3 + $0x1], 0 }
   0x2   :  { %11 = vsyncpa [#allocation6], 0 }
   0x3   :  { %12 = vsyncpa [#allocation4], 0 }
   0x4   :  { %14 = vsyncpa [#allocation4 + $0x1], 0  ;;  %s645_s12 = smov 0   ;;  %s647_s13 = smov 0  }
   0x5   :  { %s649_s14 = smov 0   ;;  %s651_s15 = smov 0  }
   0x6 LB: > { %s666_s16 = sadd.s32 4294967295, %s620_s15   ;;  %s419_s17 = sadd.s32 4294967294, %s620_s15   ;;  %s620_s15 = sphi %s651_s15, %s880_s15   ;;  %s616_s14 = sphi %s649_s14, %s879_s14   ;;  %s612_s13 = sphi %s647_s13, %s878_s13   ;;  %s608_s12 = sphi %s645_s12, %s877_s12  }
   0x7   : > { %p40_p0 = scmp.ne.s32.totalorder %s612_s13, %s608_s12  ;;  %p857_p1 = scmp.eq.s32.totalorder %s666_s16, 0 }
   0x8   : > { %p112_p3 = scmp.eq.s32.totalorder %s419_s17, 1  ;;  %p420_p5 = scmp.ge.s32.totalorder %s620_s15, 1 }
   0x9   : > { %p675_p4 = por %p857_p1, %p40_p0  ;;  %p119_p7 = scmp.lt.s32.totalorder %s620_s15, 3 }
   0xa   : > { %p680_p6 = por %p112_p3, %p40_p0  ;;  %s622_s21 = smov [#allocation5]  }
   0xb   : > { %s860_s18 = scalar_select %p675_p4, 1, 0 }
   0xc   : > { %s861_s19 = scalar_select %p680_p6, 1, 0 }
   0xd   : > { %p685_p8 = pnand %p420_p5, %p119_p7  ;;  %s132_s22 = sshll.u32 %s622_s21, 4  ;;  %s133_s22 = int_to_ptr.vmem [resolvable:$true] %s132_s22 }
   0xe   : > { %s693_s23 = sadd.s32 1, %s620_s15   ;;  %s27_s27 = sadd.s32 1, %s616_s14 }
   0xf   : > { %s862_s20 = scalar_select %p685_p8, 1, 0 }
  0x10   : > { %p441_p10 = pneg %p685_p8  ;;  %s24_s25 = ssub.s32 %s620_s15, %s693_s23 }
  0x11   : > { %p703_p12 = scmp.eq.s32.totalorder %s24_s25, 0  ;;  %s492_s30 = scalar_lea.hbm %s854_s1, 96 }
  0x12   : > { %p697_p11 = pnand %p441_p10, %p857_p1  ;;  %p493_p0 = scmp.ne.s32.totalorder %s854_s1, %s492_s30 }
  0x13   : > { %s864_s26 = scalar_select %p703_p12, 1, 0 }
  0x14   : > { %p494_p3 = pneg %p697_p11  ;;  %p499_p10 = scmp.lt.u32.totalorder %s492_s30, %s854_s1 }
  0x16   : > { %p495_p5 = pnand %p494_p3, %p493_p0 }
  0x18   : > { %p496_p7 = pneg %p495_p5 }
  0x1a   : > { %p501_p9 = pnand %p499_p10, %p496_p7 }
  0x1c   : > { %504 = shalt.err (!%p501_p9)
}
  0x1d   : > { %s505_s8 = scalar_lea.vmem %s133_s22, 96  ;;  %p513_p6 = scmp.lt.s32.totalorder %s133_s22, %s133_s22 }
  0x1e   : > { %p506_p1 = scmp.ne.s32.totalorder %s133_s22, %s505_s8  ;;  %p514_p4 = scmp.lt.s32.totalorder %s505_s8, %s505_s8 }
  0x20   : > { %p508_p2 = pnand %p506_p1, %p494_p3  ;;  %p515_p8 = por %p514_p4, %p513_p6 }
  0x22   : > { %p509_p13 = pneg %p508_p2 }
  0x24   : > { %p516_p12 = pnand %p515_p8, %p509_p13 }
  0x26   : > { %519 = shalt.err (!%p516_p12)
}
  0x27   : > { %444 = dma.hbm_to_vmem [thread:$0]  (!%p697_p11), %s854_s1, 96, %s133_s22, [#allocation6]  }
  0x28   : > { %p865_p1 = scmp.ne.s32.totalorder %s864_s26, 0  ;;  %p35_p2 = scmp.eq.s32.totalorder %s620_s15, 0 }
  0x29   : > { %p866_p4 = scmp.ne.s32.totalorder %s616_s14, %s612_s13  ;;  %p867_p6 = scmp.eq.s32.totalorder %s666_s16, 1 }
  0x2a   : > { %s729_s11 = scalar_select %p865_p1, %s616_s14, %s27_s27  }
  0x2b   : > { %p737_p8 = por %p867_p6, %p866_p4  ;;  %p454_p9 = scmp.lt.s32.totalorder %s620_s15, 2 }
  0x2c   : > { %s146_s21 = sand.u32 1, %s616_s14   ;;  %p869_p12 = pmov %p866_p4 }
  0x2d   : > { %s429_s24 = smul.u32 48, %s146_s21  ;;  %s147_s4 = scalar_lea.sflag [#allocation3], %s146_s21 }
  0x2e   : > { %p36_p13 = por %p35_p2, %p869_p12  ;;  %s430_s25 = smul.u32 768, %s620_s15 }
  0x2f   : > { %s150_s29 = scalar_lea.vmem [#allocation2], %s429_s24  ;;  %s525_s8 = scalar_lea.hbm %s853_s0, 1536 }
  0x30   : > { %p747_p0 = pnand %p454_p9, %p36_p13  ;;  %s754_s27 = scalar_lea.hbm %s853_s0, %s430_s25 }
  0x31   : > { %s158_s30 = sshll.u32 %s150_s29, 4  ;;  %s520_s5 = scalar_lea.hbm %s754_s27, 768  ;;  %s756_s30 = int_to_ptr.vmem [resolvable:$true] %s158_s30 }
  0x32   : > { %p521_p11 = scmp.ne.s32.totalorder %s754_s27, %s520_s5  ;;  %p522_p3 = pneg %p747_p0 }
  0x33   : > { %p526_p10 = scmp.lt.u32.totalorder %s754_s27, %s853_s0  ;;  %p527_p1 = scmp.lt.u32.totalorder %s525_s8, %s520_s5 }
  0x34   : > { %p523_p5 = pnand %p522_p3, %p521_p11  ;;  %p529_p4 = scmp.lt.u32.totalorder %s520_s5, %s754_s27 }
  0x35   : > { %p528_p2 = por %p527_p1, %p526_p10 }
  0x36   : > { %p524_p7 = pneg %p523_p5 }
  0x37   : > { %p530_p6 = por %p529_p4, %p528_p2 }
  0x39   : > { %p531_p9 = pnand %p530_p6, %p524_p7 }
  0x3b   : > { %534 = shalt.err (!%p531_p9)
}
  0x3c   : > { %s535_s21 = scalar_lea.vmem %s756_s30, 768  ;;  %s623_s24 = smov [#allocation2]  }
  0x3d   : > { %p536_p12 = scmp.ne.s32.totalorder %s756_s30, %s535_s21  ;;  %s540_s25 = sshll.u32 %s623_s24, 4  ;;  %s541_s25 = int_to_ptr.vmem [resolvable:$false] %s540_s25 }
  0x3e   : > { %s542_s22 = scalar_lea.vmem %s541_s25, 1536  ;;  %p543_p5 = scmp.lt.s32.totalorder %s756_s30, %s541_s25 }
  0x3f   : > { %p538_p13 = pnand %p536_p12, %p522_p3  ;;  %p544_p10 = scmp.lt.s32.totalorder %s542_s22, %s535_s21 }
  0x41   : > { %p539_p11 = pneg %p538_p13  ;;  %p545_p1 = por %p544_p10, %p543_p5 }
  0x43   : > { %p546_p2 = pnand %p545_p1, %p539_p11 }
  0x45   : > { %549 = shalt.err (!%p546_p2)
}
  0x46   : > { %448 = dma.hbm_to_vmem [thread:$0]  (!%p747_p0), %s754_s27, 768, %s756_s30, %s147_s4  }
  0x47   : > { %p871_p7 = scmp.ne.s32.totalorder %s862_s20, 0 }
  0x48   : > { %s786_s26 = sand.u32 (!%p871_p7), 1, %s612_s13   ;;  %p872_p3 = scmp.ne.s32.totalorder (!%p871_p7), %s860_s18, 0 }
  0x49   : > { %167 = sbr.rel (%p871_p7) target bundleno = 432 (0x1b0), region = 32  ;;  %s170_s5 = scalar_lea.sflag (!%p871_p7), [#allocation3], %s786_s26 }
  0x4a   : > { %s431_s29 = smul.u32 (!%p871_p7), 48, %s786_s26 }
  0x4c   : > { %s173_s6 = scalar_lea.vmem (!%p871_p7), [#allocation2], %s431_s29 }
  0x50   : > { %595 = dma.done.wait (%p872_p3), %s170_s5, 768  }
  0x51   : > { %597 = vsyncadd (%p872_p3), %s170_s5, 4294966528  ;;  %p873_p0 = scmp.eq.s32.totalorder %s666_s16, 0 }
  0x53   : > { %599 = dma.done.wait (%p873_p0), [#allocation6], 96   ;;  %p874_p4 = pmov %p873_p0 }
  0x54   : > { %v200_v0 = vld [vmem:[%s173_s6] sm:$0xff]  ;;  %v201_v1 = vld [vmem:[%s173_s6 + $0x8] sm:$0xff]  ;;  %v202_v2 = vld [vmem:[%s173_s6 + $0x10] sm:$0xff]  ;;  %v244_v32 = vlaneseq  ;;  %s432_s28 = smul.u32 768, %s666_s16  ;;  %s199_s27 = scalar_lea.vmem [#allocation7], %s431_s29 }
  0x55   : > { %601 = vsyncadd (%p874_p4), [#allocation6], 4294967200  ;;  %v206_v3 = vadd.f32 %v201_v1, %v200_v0  ;;  %v203_v4 = vld [vmem:[%s173_s6 + $0x18] sm:$0xff]  ;;  %v204_v6 = vld [vmem:[%s173_s6 + $0x20] sm:$0xff]  ;;  %s339_s30 = sshll.u32 %s199_s27, 4  ;;  %s325_s8 = scalar_lea.sflag [#allocation4], %s786_s26  ;;  %s811_s30 = int_to_ptr.vmem [resolvable:$true] %s339_s30 }
  0x56   : > { %v205_v8 = vld [vmem:[%s173_s6 + $0x28] sm:$0xff]  ;;  %v245_v34 = vshrl.u32 %v244_v32, 7  ;;  %v242_v37 = vld [vmem:[#allocation5] sm:$0x3f]  ;;  %s809_s16 = scalar_lea.hbm %s856_s3, %s432_s28  ;;  %s550_s9 = scalar_lea.vmem %s811_s30, 768 }
  0x57   : > { %v207_v5 = vadd.f32 %v206_v3, %v202_v2  ;;  %v280_v42 = vld [vmem:[%s855_s2] sm:$0x3f]  ;;  %p551_p6 = scmp.ne.s32.totalorder %s811_s30, %s550_s9  ;;  %s624_s10 = smov [#allocation7]  }
  0x58   : > { %v246_v35 = vsub.s32 0, %v245_v34  ;;  %v250_v36 = vsub.s32 1, %v245_v34  ;;  %v254_v38 = vsub.s32 2, %v245_v34  ;;  %v258_v39 = vsub.s32 3, %v245_v34  ;;  %s554_s21 = sshll.u32 %s624_s10, 4  ;;  %s555_s21 = int_to_ptr.vmem [resolvable:$false] %s554_s21 }
  0x59   : > { %v208_v7 = vadd.f32 %v207_v5, %v203_v4  ;;  %v262_v40 = vsub.s32 4, %v245_v34  ;;  %v266_v41 = vsub.s32 5, %v245_v34  ;;  %p552_p9 = pnand %p551_p6, %p737_p8  ;;  %s556_s24 = scalar_lea.vmem %s555_s21, 1536 }
  0x5a   : > { %v247_v43 = vrot.slane %v242_v37, %v246_v35  ;;  %v251_v44 = vrot.slane %v242_v37, %v250_v36  ;;  %v255_v45 = vrot.slane %v242_v37, %v254_v38  ;;  %v259_v46 = vrot.slane %v242_v37, %v258_v39  ;;  %p557_p13 = scmp.lt.s32.totalorder %s811_s30, %s555_s21  ;;  %p558_p11 = scmp.lt.s32.totalorder %s556_s24, %s550_s9 }
  0x5b   : > { %v209_v9 = vadd.f32 %v208_v7, %v204_v6  ;;  %v263_v47 = vrot.slane %v242_v37, %v262_v40  ;;  %v267_v48 = vrot.slane %v242_v37, %v266_v41  ;;  %v285_v50 = vrot.slane %v280_v42, %v246_v35  ;;  %p553_p12 = pneg %p552_p9 }
  0x5c   : > { %v289_v51 = vrot.slane %v280_v42, %v250_v36  ;;  %v293_v52 = vrot.slane %v280_v42, %v254_v38  ;;  %v297_v53 = vrot.slane %v280_v42, %v258_v39  ;;  %v301_v60 = vrot.slane %v280_v42, %v262_v40  ;;  %p559_p5 = por %p558_p11, %p557_p13 }
  0x5d   : > { %v210_v10 = vadd.f32 %v209_v9, %v205_v8  ;;  %v305_v61 = vrot.slane %v280_v42, %v266_v41 }
  0x5e   : > { %p560_p10 = pnand %p559_p5, %p553_p12 }
  0x5f   : > { %211 = vadd.xlane.f32.xlu0 %v210_v10 }
  0xec   : > { %v212_v11 = vpop.xlane.xlu0 %211 }
  0xed   : > { %v213_v12 = vmul.f32 0.0013020834, %v212_v11 }
  0xef   : > { %v214_v13 = vsub.f32 %v200_v0, %v213_v12  ;;  %v215_v14 = vsub.f32 %v201_v1, %v213_v12  ;;  %v216_v15 = vsub.f32 %v202_v2, %v213_v12  ;;  %v217_v16 = vsub.f32 %v203_v4, %v213_v12 }
  0xf0   : > { %v218_v19 = vsub.f32 %v204_v6, %v213_v12  ;;  %v219_v22 = vsub.f32 %v205_v8, %v213_v12 }
  0xf1   : > { %v220_v17 = vmul.f32 %v214_v13, %v214_v13  ;;  %v221_v18 = vmul.f32 %v215_v14, %v215_v14  ;;  %v222_v20 = vmul.f32 %v216_v15, %v216_v15  ;;  %v223_v23 = vmul.f32 %v217_v16, %v217_v16 }
  0xf2   : > { %v224_v25 = vmul.f32 %v218_v19, %v218_v19  ;;  %v225_v27 = vmul.f32 %v219_v22, %v219_v22 }
  0xf3   : > { %v226_v21 = vadd.f32 %v221_v18, %v220_v17 }
  0xf5   : > { %v227_v24 = vadd.f32 %v226_v21, %v222_v20 }
  0xf7   : > { %v228_v26 = vadd.f32 %v227_v24, %v223_v23 }
  0xf9   : > { %v229_v28 = vadd.f32 %v228_v26, %v224_v25 }
  0xfb   : > { %v230_v29 = vadd.f32 %v229_v28, %v225_v27 }
  0xfd   : > { %231 = vadd.xlane.f32.xlu0 %v230_v29 }
 0x18a   : > { %v232_v30 = vpop.xlane.xlu0 %231 }
 0x18b   : > { %v233_v31 = vmul.f32 0.0013020834, %v232_v30 }
 0x18d   : > { %v234_v33 = vadd.f32 1e-05, %v233_v31 }
 0x18f   : > { %490 = vrsqrt.f32 %v234_v33 }
 0x199   : > { %v491_v49 = vpop.eup %490 }
 0x19a   : > { %v236_v54 = vmul.f32 %v491_v49, %v214_v13  ;;  %v237_v55 = vmul.f32 %v491_v49, %v215_v14  ;;  %v238_v56 = vmul.f32 %v491_v49, %v216_v15  ;;  %v239_v57 = vmul.f32 %v491_v49, %v217_v16 }
 0x19b   : > { %v240_v58 = vmul.f32 %v491_v49, %v218_v19  ;;  %v241_v59 = vmul.f32 %v491_v49, %v219_v22 }
 0x19c   : > { %v274_v62 = vmul.f32 %v247_v43, %v236_v54  ;;  %v275_v63 = vmul.f32 %v251_v44, %v237_v55  ;;  %v276_v0 = vmul.f32 %v255_v45, %v238_v56  ;;  %v277_v1 = vmul.f32 %v259_v46, %v239_v57 }
 0x19d   : > { %v278_v2 = vmul.f32 %v263_v47, %v240_v58  ;;  %v279_v3 = vmul.f32 %v267_v48, %v241_v59 }
 0x19e   : > { %v312_v4 = vadd.f32 %v285_v50, %v274_v62  ;;  %v313_v5 = vadd.f32 %v289_v51, %v275_v63  ;;  %v314_v6 = vadd.f32 %v293_v52, %v276_v0  ;;  %v315_v7 = vadd.f32 %v297_v53, %v277_v1 }
 0x19f   : > { %v316_v8 = vadd.f32 %v301_v60, %v278_v2  ;;  %v317_v9 = vadd.f32 %v305_v61, %v279_v3 }
 0x1a0   : > { %318 = vst [vmem:[%s199_s27] sm:$0xff] %v312_v4  ;;  %319 = vst [vmem:[%s199_s27 + $0x8] sm:$0xff] %v313_v5 }
 0x1a1   : > { %320 = vst [vmem:[%s199_s27 + $0x10] sm:$0xff] %v314_v6  ;;  %321 = vst [vmem:[%s199_s27 + $0x18] sm:$0xff] %v315_v7 }
 0x1a2   : > { %322 = vst [vmem:[%s199_s27 + $0x20] sm:$0xff] %v316_v8  ;;  %323 = vst [vmem:[%s199_s27 + $0x28] sm:$0xff] %v317_v9 }
 0x1a3   : > { %563 = shalt.err (!%p560_p10)
}
 0x1a4   : > { %s564_s25 = scalar_lea.hbm %s809_s16, 768  ;;  %s568_s29 = scalar_lea.hbm %s856_s3, 1536 }
 0x1a5   : > { %p565_p1 = scmp.ne.s32.totalorder %s809_s16, %s564_s25  ;;  %p569_p3 = scmp.lt.u32.totalorder %s809_s16, %s856_s3 }
 0x1a6   : > { %p570_p0 = scmp.lt.u32.totalorder %s568_s29, %s564_s25  ;;  %p572_p6 = scmp.lt.u32.totalorder %s564_s25, %s809_s16 }
 0x1a7   : > { %p566_p2 = pnand %p565_p1, %p737_p8 }
 0x1a8   : > { %p571_p4 = por %p570_p0, %p569_p3 }
 0x1a9   : > { %p567_p7 = pneg %p566_p2 }
 0x1aa   : > { %p573_p9 = por %p572_p6, %p571_p4 }
 0x1ac   : > { %p574_p12 = pnand %p573_p9, %p567_p7 }
 0x1ae   : > { %577 = shalt.err (!%p574_p12)
}
 0x1af   : > { %439 = dma.vmem_to_hbm [thread:$0]  (%p737_p8), %s811_s30, 768, %s809_s16, %s325_s8  }
 0x1b0 PF: > { %s351_s18 = sand.u32 1, %s608_s12   ;;  %p875_p13 = scmp.ne.s32.totalorder %s861_s19, 0 }
 0x1b1   : > { %p876_p11 = scmp.ge.s32.totalorder %s620_s15, 2  ;;  %s352_s20 = scalar_lea.sflag [#allocation4], %s351_s18 }
 0x1b3   : > { %p450_p5 = pnand %p876_p11, %p875_p13 }
 0x1b5   : > { %603 = dma.done.wait (!%p450_p5), %s352_s20, 768  }
 0x1b6   : > { %605 = vsyncadd (!%p450_p5), %s352_s20, 4294966528  ;;  %p17_p10 = scmp.ge.s32.totalorder %s693_s23, 4   ;;  %s877_s12 = smov %s612_s13 }
 0x1b7   : > { %s878_s13 = smov %s616_s14  ;;  %s879_s14 = smov %s729_s11 }
 0x1b8   : > { %s880_s15 = smov %s693_s23  ;;  %19 = sbr.rel (!%p17_p10) target bundleno = 6 (0x6), region = 81 }
 0x1bf   :  { %357 = vsyncpa [#allocation3], 1 }
 0x1c0   :  { %359 = vsyncpa [#allocation3 + $0x1], 1 }
 0x1c1   :  { %360 = vsyncpa [#allocation6], 1 }
 0x1c2   :  { %361 = vsyncpa [#allocation4], 1 }
 0x1c3   :  { %363 = vsyncpa [#allocation4 + $0x1], 1 }

</bundles_post_ra>
